<compile_context>
chip_gen: v7x
topology: tpu7x:2x2x1
jax: 0.10.0
libtpu: 0.0.40
codegen_flags: <defaults>
</compile_context>

<pallas_src>
import jax
import jax.numpy as jnp
from jax.experimental import pallas as pl
from jax.experimental.pallas import tpu as pltpu


def _make_mlp_kernel(chunk, n_chunks):
    """Kernel over one (10, tb) transposed batch tile, tb = chunk * n_chunks."""

    def mlp_kernel(xT_ref, w1_ref, b1_ref, w2_ref, b2_ref, w3_ref, b3_ref, o_ref):
        # Weights are tiny (<10 KB total) and VMEM-resident; load once.
        w1 = w1_ref[...]   # (50, 10)
        b1 = b1_ref[...]   # (50, 1)
        w2 = w2_ref[...]   # (20, 50)
        b2 = b2_ref[...]   # (20, 1)
        w3 = w3_ref[...]   # (1, 20)
        b3 = b3_ref[0, 0]  # scalar from SMEM

        hi = jax.lax.Precision.HIGHEST

        # Static chunk loop: offsets are compile-time constants -> zero-cost
        # Ref views, and each chunk ends in a store so intermediates die early.
        for c in range(n_chunks):
            s = c * chunk
            xc = xT_ref[:, s:s + chunk]                              # (10, ch)
            h1 = jnp.dot(w1, xc, preferred_element_type=jnp.float32,
                         precision=hi)
            h1 = jnp.maximum(h1 + b1, 0.0)                           # (50, ch)
            h2 = jnp.dot(w2, h1, preferred_element_type=jnp.float32,
                         precision=hi)
            h2 = jnp.maximum(h2 + b2, 0.0)                           # (20, ch)
            y = jnp.dot(w3, h2, preferred_element_type=jnp.float32,
                        precision=hi) + b3                           # (1, ch)
            o_ref[:, s:s + chunk] = y.astype(o_ref.dtype)            # lane-dense store

    return mlp_kernel


def _round_up(x, m):
    return ((x + m - 1) // m) * m


def regression_model_forward(x, params, *, tb=4096):
    """x: (B, 10) f32. params: PyTorch-layout weights (out,in), biases (out,1)."""
    B = x.shape[0]
    w1, b1, w2, b2, w3, b3 = (params["w1"], params["b1"], params["w2"],
                              params["b2"], params["w3"], params["b3"])

    # Batch tile (lane axis).  Small B: one full-batch tile (block == full dim,
    # always layout-legal).  Large B: multiple-of-128 tile, and at least 2 grid
    # steps so both v7x TensorCores get work (no-op on single-TC v5e/v6e).
    if B <= 256:
        tb_eff = B
    else:
        tb_eff = min(_round_up(tb, 128), _round_up(pl.cdiv(B, 2), 128))
        tb_eff = max(tb_eff, 128)

    # In-tile chunk size: bounds vreg pressure (h1 chunk <= 28 vregs) while
    # keeping lane-dense 128-multiple stores.
    if tb_eff % 512 == 0:
        chunk = 512
    elif tb_eff % 256 == 0:
        chunk = 256
    elif tb_eff % 128 == 0:
        chunk = 128
    else:
        chunk = tb_eff
    n_chunks = tb_eff // chunk

    grid = (pl.cdiv(B, tb_eff),)

    # Transposed input: batch on lanes.  (B,10)->(10,B) is a tiny one-off
    # wrapper transpose; the (1,B)->(B,1) output reshape below is free.
    xT = jnp.transpose(x)

    # Weights/biases: full-array blocks with constant index_maps -> resident in
    # VMEM across all batch tiles (no per-tile re-DMA).
    const = lambda shape: pl.BlockSpec(shape, lambda i: (0,) * len(shape))

    out = pl.pallas_call(
        _make_mlp_kernel(chunk, n_chunks),
        out_shape=jax.ShapeDtypeStruct((1, B), jnp.float32),
        grid=grid,
        in_specs=[
            pl.BlockSpec((10, tb_eff), lambda i: (0, i)),     # streamed xT tile
            const(w1.shape), const(b1.shape),
            const(w2.shape), const(b2.shape),
            const(w3.shape),
            pl.BlockSpec(memory_space=pltpu.MemorySpace.SMEM),  # scalar b3
        ],
        out_specs=pl.BlockSpec((1, tb_eff), lambda i: (0, i)),   # lane-dense slab
        compiler_params=pltpu.CompilerParams(
            dimension_semantics=("parallel",)),                  # megacore on v7x
    )(xT, w1, b1, w2, b2, w3, b3)

    return out.reshape(B, 1)


def init_params(key):
    """PyTorch nn.Linear default init: U(-1/sqrt(fan_in), 1/sqrt(fan_in)),
    stored in PyTorch layout: weight (out, in), bias (out, 1)."""
    sizes = [(10, 50), (50, 20), (20, 1)]
    params = {}
    for i, (fan_in, fan_out) in enumerate(sizes, start=1):
        key, kw, kb = jax.random.split(key, 3)
        bound = 1.0 / jnp.sqrt(float(fan_in))
        params[f"w{i}"] = jax.random.uniform(
            kw, (fan_out, fan_in), jnp.float32, -bound, bound)
        params[f"b{i}"] = jax.random.uniform(
            kb, (fan_out, 1), jnp.float32, -bound, bound)
    return params


def _ref(x, p):
    h1 = jnp.maximum(x @ p["w1"].T + p["b1"].T, 0.0)
    h2 = jnp.maximum(h1 @ p["w2"].T + p["b2"].T, 0.0)
    return h2 @ p["w3"].T + p["b3"].T


if __name__ == "__main__":
    key = jax.random.PRNGKey(0)
    key, kx1, kx2 = jax.random.split(key, 3)
    params = init_params(key)

    # Small single-tile path.
    B = 8
    x = jax.random.normal(kx1, (B, 10), dtype=jnp.float32)
    out = jax.block_until_ready(regression_model_forward(x, params))
    assert out.shape == (B, 1)
    assert jnp.allclose(out, _ref(x, params), atol=1e-5, rtol=1e-5)

    # Multi-tile path: grid of 3 with a partial (padded) last block.
    B2 = 300
    x2 = jax.random.normal(kx2, (B2, 10), dtype=jnp.float32)
    out2 = jax.block_until_ready(regression_model_forward(x2, params, tb=128))
    assert out2.shape == (B2, 1)
    assert jnp.allclose(out2, _ref(x2, params), atol=1e-5, rtol=1e-5)

    print("KERNEL_OK")
</pallas_src>

<mosaic_0001>
module attributes {stable_mosaic.version = 11 : i64} {
  func.func @mlp_kernel(%arg0: i32, %arg1: memref<10x8xf32, #tpu.memory_space<vmem>>, %arg2: memref<50x10xf32, #tpu.memory_space<vmem>>, %arg3: memref<50x1xf32, #tpu.memory_space<vmem>>, %arg4: memref<20x50xf32, #tpu.memory_space<vmem>>, %arg5: memref<20x1xf32, #tpu.memory_space<vmem>>, %arg6: memref<1x20xf32, #tpu.memory_space<vmem>>, %arg7: memref<1x1xf32, #tpu.memory_space<smem>>, %arg8: memref<1x8xf32, #tpu.memory_space<vmem>>) attributes {dimension_semantics = [#tpu.dimension_semantics<parallel>], iteration_bounds = array<i64: 1>, scalar_prefetch = 0 : i64, scratch_operands = 0 : i64, tpu.core_type = #tpu.core_type<tc>, window_params = [{transform_indices = @transform_0, window_bounds = array<i64: 10, 8>}, {pipeline_mode = #tpu.pipeline_mode<synchronous>, transform_indices = @transform_1, window_bounds = array<i64: 50, 10>}, {pipeline_mode = #tpu.pipeline_mode<synchronous>, transform_indices = @transform_2, window_bounds = array<i64: 50, 1>}, {pipeline_mode = #tpu.pipeline_mode<synchronous>, transform_indices = @transform_3, window_bounds = array<i64: 20, 50>}, {pipeline_mode = #tpu.pipeline_mode<synchronous>, transform_indices = @transform_4, window_bounds = array<i64: 20, 1>}, {pipeline_mode = #tpu.pipeline_mode<synchronous>, transform_indices = @transform_5, window_bounds = array<i64: 1, 20>}, {transform_indices = @transform_6, window_bounds = array<i64: 1, 1>}, {transform_indices = @transform_7, window_bounds = array<i64: 1, 8>}]} {
    %c0 = arith.constant 0 : index
    %c0_0 = arith.constant 0 : index
    %0 = vector.load %arg2[%c0, %c0_0] : memref<50x10xf32, #tpu.memory_space<vmem>>, vector<50x10xf32>
    %c0_1 = arith.constant 0 : index
    %c0_2 = arith.constant 0 : index
    %1 = vector.load %arg3[%c0_1, %c0_2] : memref<50x1xf32, #tpu.memory_space<vmem>>, vector<50x1xf32>
    %c0_3 = arith.constant 0 : index
    %c0_4 = arith.constant 0 : index
    %2 = vector.load %arg4[%c0_3, %c0_4] : memref<20x50xf32, #tpu.memory_space<vmem>>, vector<20x50xf32>
    %c0_5 = arith.constant 0 : index
    %c0_6 = arith.constant 0 : index
    %3 = vector.load %arg5[%c0_5, %c0_6] : memref<20x1xf32, #tpu.memory_space<vmem>>, vector<20x1xf32>
    %c0_7 = arith.constant 0 : index
    %c0_8 = arith.constant 0 : index
    %4 = vector.load %arg6[%c0_7, %c0_8] : memref<1x20xf32, #tpu.memory_space<vmem>>, vector<1x20xf32>
    %c0_9 = arith.constant 0 : index
    %c0_10 = arith.constant 0 : index
    %5 = memref.load %arg7[%c0_9, %c0_10] : memref<1x1xf32, #tpu.memory_space<smem>>
    %c0_11 = arith.constant 0 : index
    %c0_12 = arith.constant 0 : index
    %6 = vector.load %arg1[%c0_11, %c0_12] : memref<10x8xf32, #tpu.memory_space<vmem>>, vector<10x8xf32>
    %cst = arith.constant dense<0.000000e+00> : vector<50x8xf32>
    %7 = tpu.matmul %0, %6, %cst {dimension_numbers = #tpu.dot_dimension_numbers<[1], [0], [0], [1], [0, 0, 1, 1], [], []>, precision = #tpu.contract_precision<fp32>} : vector<50x10xf32>, vector<10x8xf32>, vector<50x8xf32> -> vector<50x8xf32>
    %8 = vector.broadcast %1 : vector<50x1xf32> to vector<50x8xf32>
    %9 = arith.addf %7, %8 : vector<50x8xf32>
    %cst_13 = arith.constant 0.000000e+00 : f32
    %10 = vector.broadcast %cst_13 : f32 to vector<50x8xf32>
    %11 = arith.maximumf %9, %10 : vector<50x8xf32>
    %cst_14 = arith.constant dense<0.000000e+00> : vector<20x8xf32>
    %12 = tpu.matmul %2, %11, %cst_14 {dimension_numbers = #tpu.dot_dimension_numbers<[1], [0], [0], [1], [0, 0, 1, 1], [], []>, precision = #tpu.contract_precision<fp32>} : vector<20x50xf32>, vector<50x8xf32>, vector<20x8xf32> -> vector<20x8xf32>
    %13 = vector.broadcast %3 : vector<20x1xf32> to vector<20x8xf32>
    %14 = arith.addf %12, %13 : vector<20x8xf32>
    %cst_15 = arith.constant 0.000000e+00 : f32
    %15 = vector.broadcast %cst_15 : f32 to vector<20x8xf32>
    %16 = arith.maximumf %14, %15 : vector<20x8xf32>
    %cst_16 = arith.constant dense<0.000000e+00> : vector<1x8xf32>
    %17 = tpu.matmul %4, %16, %cst_16 {dimension_numbers = #tpu.dot_dimension_numbers<[1], [0], [0], [1], [0, 0, 1, 1], [], []>, precision = #tpu.contract_precision<fp32>} : vector<1x20xf32>, vector<20x8xf32>, vector<1x8xf32> -> vector<1x8xf32>
    %18 = vector.broadcast %5 : f32 to vector<1x8xf32>
    %19 = arith.addf %17, %18 : vector<1x8xf32>
    %c0_17 = arith.constant 0 : index
    %c0_18 = arith.constant 0 : index
    %20 = vector.load %arg8[%c0_17, %c0_18] : memref<1x8xf32, #tpu.memory_space<vmem>>, vector<1x8xf32>
    tpu.vector_store %arg8[%c0_17, %c0_18], %19 {strides = array<i32>} : memref<1x8xf32, #tpu.memory_space<vmem>>, vector<1x8xf32>,
    return
  }
  func.func @transform_0(%arg0: i32) -> (i32, i32) {
    %c0_i32 = arith.constant 0 : i32
    %c0_i32_0 = arith.constant 0 : i32
    return %c0_i32, %arg0 : i32, i32
  }
  func.func @transform_1(%arg0: i32) -> (i32, i32) {
    %c0_i32 = arith.constant 0 : i32
    %c0_i32_0 = arith.constant 0 : i32
    %c0_i32_1 = arith.constant 0 : i32
    return %c0_i32, %c0_i32_0 : i32, i32
  }
  func.func @transform_2(%arg0: i32) -> (i32, i32) {
    %c0_i32 = arith.constant 0 : i32
    %c0_i32_0 = arith.constant 0 : i32
    %c0_i32_1 = arith.constant 0 : i32
    return %c0_i32, %c0_i32_0 : i32, i32
  }
  func.func @transform_3(%arg0: i32) -> (i32, i32) {
    %c0_i32 = arith.constant 0 : i32
    %c0_i32_0 = arith.constant 0 : i32
    %c0_i32_1 = arith.constant 0 : i32
    return %c0_i32, %c0_i32_0 : i32, i32
  }
  func.func @transform_4(%arg0: i32) -> (i32, i32) {
    %c0_i32 = arith.constant 0 : i32
    %c0_i32_0 = arith.constant 0 : i32
    %c0_i32_1 = arith.constant 0 : i32
    return %c0_i32, %c0_i32_0 : i32, i32
  }
  func.func @transform_5(%arg0: i32) -> (i32, i32) {
    %c0_i32 = arith.constant 0 : i32
    %c0_i32_0 = arith.constant 0 : i32
    %c0_i32_1 = arith.constant 0 : i32
    return %c0_i32, %c0_i32_0 : i32, i32
  }
  func.func @transform_6(%arg0: i32) -> (i32, i32) {
    %c0_i32 = arith.constant 0 : i32
    %c0_i32_0 = arith.constant 0 : i32
    %c0_i32_1 = arith.constant 0 : i32
    return %c0_i32, %c0_i32_0 : i32, i32
  }
  func.func @transform_7(%arg0: i32) -> (i32, i32) {
    %c0_i32 = arith.constant 0 : i32
    %c0_i32_0 = arith.constant 0 : i32
    return %c0_i32, %arg0 : i32, i32
  }
}

</mosaic_0001>

<bundles_post_ra>
// kernel: tpu_custom_call.1
= control target key start
LH: loop header
LB: loop body
LE: loop exit
PB: predicated region body
PF: predicated region fallthrough
CT: control target
= control target key end

     0   :  { %vm109_vm0 = vcmask 1041408   ;;  %v2690_v2 = vmov 0.0|0.0   ;;  %vm87_vm1 = vcmask 80896   ;;  %vm2691_vm2 = vmmov 0   ;;  %s3234_s0 = inlined_call_operand.vmem [shape: f32[10,8], index: 0, kind: input, shape index: {}]   ;;  %s3235_s1 = inlined_call_operand.vmem [shape: f32[50,10], index: 1, kind: input, shape index: {}]   ;;  %s3236_s2 = inlined_call_operand.vmem [shape: f32[50,1], index: 2, kind: input, shape index: {}]   ;;  %s3237_s3 = inlined_call_operand.vmem [shape: f32[20,50], index: 3, kind: input, shape index: {}]   ;;  %s3238_s4 = inlined_call_operand.vmem [shape: f32[20,1], index: 4, kind: input, shape index: {}]   ;;  %s3239_s5 = inlined_call_operand.vmem [shape: f32[1,20], index: 5, kind: input, shape index: {}]   ;;  %s3240_s6 = inlined_call_operand.<no memory space> [shape: f32[1,1], index: 6, kind: input, shape index: {}]   ;;  %s3241_s7 = inlined_call_operand.hbm [shape: f32[1,8], index: 7, kind: output, shape index: {}]  }
   0x1   :  { %v50_v0 = vld [vmem:[%s3234_s0] sm:$0xff]  ;;  %v51_v1 = vld [vmem:[%s3234_s0 + $0x8] sm:$0x3]  ;;  %2458 = vmatprep.subr.bf16.mxu0 %v2690_v2  ;;  %2455 = vmatprep.subr.bf16.mxu1 %v2690_v2  ;;  %v2692_v8 = vmov 0.0   ;;  %v30_v13 = vld [vmem:[%s3235_s1 + $0x10] sm:$0xff] }
   0x2   :  { %v111_v3 = vsel %vm109_vm0, %v51_v1, 0  ;;  %v114_v4 = vand.u32 4294901760, %v50_v0  ;;  %v28_v5 = vld [vmem:[%s3235_s1] sm:$0xff]  ;;  %v29_v6 = vld [vmem:[%s3235_s1 + $0x8] sm:$0xff]  ;;  %2142 = vmatprep.mubr.msk.f32.mxu0 %vm2691_vm2, %v2692_v8  ;;  %2117 = vmatprep.mubr.msk.f32.mxu1 %vm2691_vm2, %v2692_v8 }
   0x3   :  { %v117_v7 = vand.u32 4294901760, %v111_v3  ;;  %v89_v10 = vsel %vm87_vm1, %v28_v5, 0  ;;  %v92_v11 = vsel %vm87_vm1, %v29_v6, 0 }
   0x4   :  { %v252_v9 = vsub.f32 %v50_v0, %v114_v4 }
   0x5   :  { %v259_v12 = vsub.f32 %v111_v3, %v117_v7 }
   0x6   :  { %13 = vsyncpa [#allocation4], 0  ;;  %v253_v14 = vand.u32 4294901760, %v252_v9  ;;  %v2759_v16 = vand.u32 4294901760, %v89_v10  ;;  %v2761_v17 = vand.u32 4294901760, %v92_v11  ;;  %v95_v19 = vsel %vm87_vm1, %v30_v13, 0 }
   0x7   :  { %v260_v15 = vand.u32 4294901760, %v259_v12  ;;  %v31_v22 = vld [vmem:[%s3235_s1 + $0x18] sm:$0xff]  ;;  %v2773_v24 = vpack.c.bf16 %v117_v7, %v114_v4  ;;  %v2775_v27 = vand.u32 4294901760, %v95_v19  ;;  %v32_v33 = vld [vmem:[%s3235_s1 + $0x20] sm:$0xff]  ;;  %v2462_v37 = vpack.c.bf16 %v259_v12, %v252_v9  ;;  %v33_v42 = vld [vmem:[%s3235_s1 + $0x28] sm:$0xff]  ;;  %s2694_s18 = smov [#allocation3]  }
   0x8   :  { %v254_v18 = vsub.f32 %v252_v9, %v253_v14  ;;  %v2765_v21 = vsub.f32 %v89_v10, %v2759_v16  ;;  %v2771_v23 = vsub.f32 %v92_v11, %v2761_v17  ;;  %v98_v30 = vsel %vm87_vm1, %v31_v22, 0  ;;  %v34_v49 = vld [vmem:[%s3235_s1 + $0x30] sm:$0x3]  ;;  %v35_v59 = vld [vmem:[%s3236_s2] sm:$0xff]  ;;  %v36_v4 = vld [vmem:[%s3236_s2 + $0x8] sm:$0xff]  ;;  %s1967_s19 = sshll.u32 %s2694_s18, 4  ;;  %s1968_s19 = int_to_ptr.vmem [resolvable:$true] %s1967_s19 }
   0x9   :  { %v261_v20 = vsub.f32 %v259_v12, %v260_v15  ;;  %2457 = vmatpush3.bf16.msra.mxu1 %v2773_v24  ;;  %v2781_v31 = vpack.c.bf16 %v260_v15, %v253_v14  ;;  %v2788_v34 = vsub.f32 %v95_v19, %v2775_v27  ;;  %v2796_v38 = vand.u32 4294901760, %v98_v30  ;;  %v37_v60 = vld [vmem:[%s3236_s2 + $0x10] sm:$0xff]  ;;  %v38_v5 = vld [vmem:[%s3236_s2 + $0x18] sm:$0xff]  ;;  %v39_v10 = vld [vmem:[%s3236_s2 + $0x20] sm:$0xff]  ;;  %s2666_s20 = scalar_lea.vmem %s1968_s19, 16  ;;  %s2670_s21 = scalar_lea.vmem %s1968_s19, 32 }
   0xa   :  { %v255_v25 = vand.u32 4294901760, %v254_v18  ;;  %v182_v28 = vand.u32 4294901760, %v2765_v21  ;;  %v192_v29 = vand.u32 4294901760, %v2771_v23  ;;  %2473 = vmatprep.subr.bf16.mxu1 %v2690_v2  ;;  %v101_v41 = vsel %vm87_vm1, %v32_v33, 0  ;;  %v40_v11 = vld [vmem:[%s3236_s2 + $0x28] sm:$0xff]  ;;  %v45_v14 = vld [vmem:[%s3238_s4] sm:$0xff]  ;;  %p2667_p0 = scmp.ne.s32.totalorder %s1968_s19, %s2666_s20  ;;  %p2671_p1 = scmp.lt.s32.totalorder %s1968_s19, %s1968_s19 }
   0xb   :  { %v262_v26 = vand.u32 4294901760, %v261_v20  ;;  %v202_v39 = vand.u32 4294901760, %v2788_v34  ;;  %v2805_v43 = vsub.f32 %v98_v30, %v2796_v38  ;;  %v2815_v46 = vand.u32 4294901760, %v101_v41  ;;  %v41_v13 = vld [vmem:[%s3236_s2 + $0x30] sm:$0x3]  ;;  %v46_v15 = vld [vmem:[%s3238_s4 + $0x8] sm:$0xff]  ;;  %p2672_p2 = scmp.lt.s32.totalorder %s2670_s21, %s2666_s20 }
   0xc   :  { %v183_v35 = vsub.f32 %v2765_v21, %v182_v28  ;;  %v193_v36 = vsub.f32 %v2771_v23, %v192_v29  ;;  %v104_v48 = vsel %vm87_vm1, %v33_v42, 0  ;;  %v107_v55 = vsel %vm87_vm1, %v34_v49, 0  ;;  %v47_v18 = vld [vmem:[%s3238_s4 + $0x10] sm:$0xf] }
   0xd   :  { %v2459_v32 = vpack.c.bf16 %v262_v26, %v255_v25  ;;  %v203_v45 = vsub.f32 %v2788_v34, %v202_v39  ;;  %v212_v47 = vand.u32 4294901760, %v2805_v43  ;;  %v2824_v50 = vsub.f32 %v101_v41, %v2815_v46  ;;  %p2673_p3 = por %p2672_p2, %p2671_p1 }
   0xe   :  { %v184_v40 = vand.u32 4294901760, %v183_v35  ;;  %v194_v44 = vand.u32 4294901760, %v193_v36  ;;  %v2834_v53 = vand.u32 4294901760, %v104_v48  ;;  %v2855_v61 = vand.u32 4294901760, %v107_v55 }
   0xf   :  { %2460 = vmatpush3.bf16.msra.mxu0 %v2459_v32  ;;  %v204_v51 = vand.u32 4294901760, %v203_v45  ;;  %v213_v52 = vsub.f32 %v2805_v43, %v212_v47  ;;  %v222_v54 = vand.u32 4294901760, %v2824_v50  ;;  %v2693_v63 = vmov 0   ;;  %v42_v45 = vld [vmem:[%s3237_s3] sm:$0xff]  ;;  %p2674_p4 = pnand %p2673_p3, %p2667_p0 }
  0x10   :  { %2461 = vmatprep.subr.bf16.mxu0 %v2690_v2  ;;  %2118 = vmatmul.mubr.f32.vlgmr.msra.gmra.mrb[0].mxu1 %v184_v40  ;;  %v2839_v56 = vsub.f32 %v104_v48, %v2834_v53  ;;  %v2859_v0 = vsub.f32 %v107_v55, %v2855_v61  ;;  %vm852_vm3 = vcmask 408576   ;;  %vm1479_vm4 = vcmask 162816  }
  0x11   :  { %2120 = vmatprep.mubr.msk.f32.mxu1 %vm2691_vm2, %v2692_v8  ;;  %v214_v57 = vand.u32 4294901760, %v213_v52  ;;  %v223_v58 = vsub.f32 %v2824_v50, %v222_v54  ;;  %2664 = vset.pattern.permute.xlu0 %v2693_v63  ;;  %vm1483_vm5 = vcmask 1043456   ;;  %vm1959_vm6 = vcmask 57344  }
  0x12   :  { %2143 = vmatmul.mubr.f32.vlgmr.msra.gmra.mrb[0].mxu0 %v2759_v16  ;;  %v232_v62 = vand.u32 4294901760, %v2839_v56  ;;  %54 = vperm.xlu0 %2664, %v35_v59   ;;  %v242_v6 = vand.u32 4294901760, %v2859_v0  ;;  %v43_v59 = vld [vmem:[%s3237_s3 + $0x8] sm:$0xff] }
  0x13   :  { %2145 = vmatprep.mubr.msk.f32.mxu0 %vm2691_vm2, %v2692_v8  ;;  %2463 = vmatpush3.bf16.msra.mxu0 %v2462_v37  ;;  %v224_v1 = vand.u32 4294901760, %v223_v58 }
  0x14   :  { %2464 = vmatprep.subr.bf16.mxu0 %v2690_v2  ;;  %2121 = vmatmul.mubr.f32.gmra.mrb[2].mxu1 %v194_v44  ;;  %v233_v3 = vsub.f32 %v2839_v56, %v232_v62  ;;  %v243_v9 = vsub.f32 %v2859_v0, %v242_v6 }
  0x15   :  { %2123 = vmatprep.mubr.msk.f32.mxu1 %vm2691_vm2, %v2692_v8  ;;  %2665 = vset.pattern.permute.xlu1 %v2693_v63 }
  0x16   :  { %2146 = vmatmul.mubr.f32.gmra.mrb[2].mxu0 %v2761_v17  ;;  %64 = vperm.xlu1 %2665, %v37_v60   ;;  %v234_v7 = vand.u32 4294901760, %v233_v3  ;;  %v244_v12 = vand.u32 4294901760, %v243_v9 }
  0x17   :  { %2148 = vmatprep.mubr.msk.f32.mxu0 %vm2691_vm2, %v2692_v8  ;;  %59 = vperm.xlu0 %2664, %v36_v4  }
  0x18   :  { %2124 = vmatmul.mubr.f32.gmra.mrb[4].mxu1 %v204_v51 }
  0x19   :  { %2126 = vmatprep.mubr.msk.f32.mxu1 %vm2691_vm2, %v2692_v8 }
  0x1a   :  { %2149 = vmatmul.mubr.f32.gmra.mrb[4].mxu0 %v2775_v27  ;;  %69 = vperm.xlu1 %2665, %v38_v5  }
  0x1b   :  { %2151 = vmatprep.mubr.msk.f32.mxu0 %vm2691_vm2, %v2692_v8  ;;  %74 = vperm.xlu0 %2664, %v39_v10  }
  0x1c   :  { %2127 = vmatmul.mubr.f32.gmra.mrb[6].mxu1 %v214_v57 }
  0x1d   :  { %2129 = vmatprep.mubr.msk.f32.mxu1 %vm2691_vm2, %v2692_v8 }
  0x1e   :  { %2152 = vmatmul.mubr.f32.gmra.mrb[6].mxu0 %v2796_v38  ;;  %79 = vperm.xlu1 %2665, %v40_v11  }
  0x1f   :  { %2154 = vmatprep.mubr.msk.f32.mxu0 %vm2691_vm2, %v2692_v8  ;;  %84 = vperm.xlu0 %2664, %v41_v13  }
  0x20   :  { %2130 = vmatmul.mubr.f32.gmra.mrb[8].mxu1 %v224_v1 }
  0x21   :  { %2132 = vmatprep.mubr.msk.f32.mxu1 %vm2691_vm2, %v2692_v8 }
  0x22   :  { %2155 = vmatmul.mubr.f32.gmra.mrb[8].mxu0 %v2815_v46  ;;  %839 = vperm.xlu1 %2665, %v45_v14  }
  0x23   :  { %2157 = vmatprep.mubr.msk.f32.mxu0 %vm2691_vm2, %v2692_v8  ;;  %844 = vperm.xlu0 %2664, %v46_v15  }
  0x24   :  { %2133 = vmatmul.mubr.f32.gmra.mrb[10].mxu1 %v234_v7 }
  0x25   :  { %2135 = vmatprep.mubr.msk.f32.mxu1 %vm2691_vm2, %v2692_v8 }
  0x26   :  { %2158 = vmatmul.mubr.f32.gmra.mrb[10].mxu0 %v2834_v53  ;;  %849 = vperm.xlu1 %2665, %v47_v18  }
  0x27   :  { %2160 = vmatprep.mubr.msk.f32.mxu0 %vm2691_vm2, %v2692_v8 }
  0x28   :  { %2136 = vmatmul.mubr.f32.gmra.mrb[12].mxu1 %v244_v12  ;;  %v44_v12 = vld [vmem:[%s3237_s3 + $0x10] sm:$0xf] }
  0x29   :  { %2277 = vmatprep.mubr.msk.f32.mxu1 %vm2691_vm2, %v2692_v8 }
  0x2a   :  { %2161 = vmatmul.mubr.f32.gmra.mrb[12].mxu0 %v2855_v61 }
  0x2b   :  { %2167 = vmatprep.mubr.msk.f32.mxu0 %vm2691_vm2, %v2692_v8 }
  0x2e   :  { %2168 = vmatmul.mubr.f32.vlgmr.msra.gmra.mrb[0].mxu0 %v2765_v21 }
  0x2f   :  { %2170 = vmatprep.mubr.msk.f32.mxu0 %vm2691_vm2, %v2692_v8  ;;  %2466 = vmatpush3.bf16.msra.mxu0 %v2773_v24 }
  0x30   :  { %2467 = vmatprep.subr.bf16.mxu0 %v2690_v2 }
  0x32   :  { %2171 = vmatmul.mubr.f32.gmra.mrb[2].mxu0 %v2771_v23 }
  0x33   :  { %2173 = vmatprep.mubr.msk.f32.mxu0 %vm2691_vm2, %v2692_v8 }
  0x36   :  { %2174 = vmatmul.mubr.f32.gmra.mrb[4].mxu0 %v2788_v34 }
  0x37   :  { %2176 = vmatprep.mubr.msk.f32.mxu0 %vm2691_vm2, %v2692_v8 }
  0x3a   :  { %2177 = vmatmul.mubr.f32.gmra.mrb[6].mxu0 %v2805_v43 }
  0x3b   :  { %2179 = vmatprep.mubr.msk.f32.mxu0 %vm2691_vm2, %v2692_v8 }
  0x3e   :  { %2180 = vmatmul.mubr.f32.gmra.mrb[8].mxu0 %v2824_v50 }
  0x3f   :  { %2182 = vmatprep.mubr.msk.f32.mxu0 %vm2691_vm2, %v2692_v8 }
  0x42   :  { %2183 = vmatmul.mubr.f32.gmra.mrb[10].mxu0 %v2839_v56 }
  0x43   :  { %2185 = vmatprep.mubr.msk.f32.mxu0 %vm2691_vm2, %v2692_v8 }
  0x46   :  { %2186 = vmatmul.mubr.f32.gmra.mrb[12].mxu0 %v2859_v0 }
  0x47   :  { %2192 = vmatprep.mubr.msk.f32.mxu0 %vm2691_vm2, %v2692_v8 }
  0x4a   :  { %2193 = vmatmul.mubr.f32.vlgmr.msra.gmra.mrb[0].mxu0 %v182_v28 }
  0x4b   :  { %2195 = vmatprep.mubr.msk.f32.mxu0 %vm2691_vm2, %v2692_v8  ;;  %2469 = vmatpush3.bf16.msra.mxu0 %v2781_v31 }
  0x4c   :  { %2470 = vmatprep.subr.bf16.mxu0 %v2690_v2 }
  0x4e   :  { %2196 = vmatmul.mubr.f32.gmra.mrb[2].mxu0 %v192_v29 }
  0x4f   :  { %2198 = vmatprep.mubr.msk.f32.mxu0 %vm2691_vm2, %v2692_v8 }
  0x52   :  { %2199 = vmatmul.mubr.f32.gmra.mrb[4].mxu0 %v202_v39 }
  0x53   :  { %2201 = vmatprep.mubr.msk.f32.mxu0 %vm2691_vm2, %v2692_v8 }
  0x56   :  { %2202 = vmatmul.mubr.f32.gmra.mrb[6].mxu0 %v212_v47 }
  0x57   :  { %2204 = vmatprep.mubr.msk.f32.mxu0 %vm2691_vm2, %v2692_v8 }
  0x5a   :  { %2205 = vmatmul.mubr.f32.gmra.mrb[8].mxu0 %v222_v54  ;;  %v854_v54 = vsel %vm852_vm3, %v42_v45, 0 }
  0x5b   :  { %2207 = vmatprep.mubr.msk.f32.mxu0 %vm2691_vm2, %v2692_v8 }
  0x5e   :  { %2208 = vmatmul.mubr.f32.gmra.mrb[10].mxu0 %v232_v62 }
  0x5f   :  { %2210 = vmatprep.mubr.msk.f32.mxu0 %vm2691_vm2, %v2692_v8 }
  0x62   :  { %2211 = vmatmul.mubr.f32.gmra.mrb[12].mxu0 %v242_v6  ;;  %v857_v6 = vsel %vm852_vm3, %v43_v59, 0 }
  0x63   :  { %2217 = vmatprep.mubr.msk.f32.mxu0 %vm2691_vm2, %v2692_v8 }
  0x66   :  { %2218 = vmatmul.mubr.f32.vlgmr.msra.gmra.mrb[0].mxu0 %v2759_v16 }
  0x67   :  { %2220 = vmatprep.mubr.msk.f32.mxu0 %vm2691_vm2, %v2692_v8  ;;  %2472 = vmatpush3.bf16.msra.mxu0 %v2773_v24 }
  0x6a   :  { %2221 = vmatmul.mubr.f32.gmra.mrb[2].mxu0 %v2761_v17 }
  0x6b   :  { %2223 = vmatprep.mubr.msk.f32.mxu0 %vm2691_vm2, %v2692_v8 }
  0x6e   :  { %2224 = vmatmul.mubr.f32.gmra.mrb[4].mxu0 %v2775_v27 }
  0x6f   :  { %2226 = vmatprep.mubr.msk.f32.mxu0 %vm2691_vm2, %v2692_v8 }
  0x72   :  { %2227 = vmatmul.mubr.f32.gmra.mrb[6].mxu0 %v2796_v38 }
  0x73   :  { %2229 = vmatprep.mubr.msk.f32.mxu0 %vm2691_vm2, %v2692_v8 }
  0x76   :  { %2230 = vmatmul.mubr.f32.gmra.mrb[8].mxu0 %v2815_v46 }
  0x77   :  { %2232 = vmatprep.mubr.msk.f32.mxu0 %vm2691_vm2, %v2692_v8 }
  0x7a   :  { %2233 = vmatmul.mubr.f32.gmra.mrb[10].mxu0 %v2834_v53 }
  0x7b   :  { %2235 = vmatprep.mubr.msk.f32.mxu0 %vm2691_vm2, %v2692_v8 }
  0x7e   :  { %2236 = vmatmul.mubr.f32.gmra.mrb[12].mxu0 %v2855_v61 }
  0x7f   :  { %2242 = vmatprep.mubr.msk.f32.mxu0 %vm2691_vm2, %v2692_v8 }
  0x82   :  { %2243 = vmatmul.mubr.f32.vlgmr.msra.gmra.mrb[0].mxu0 %v2759_v16 }
  0x83   :  { %2245 = vmatprep.mubr.msk.f32.mxu0 %vm2691_vm2, %v2692_v8 }
  0x86   :  { %2246 = vmatmul.mubr.f32.gmra.mrb[2].mxu0 %v2761_v17 }
  0x87   :  { %2248 = vmatprep.mubr.msk.f32.mxu0 %vm2691_vm2, %v2692_v8 }
  0x8a   :  { %2249 = vmatmul.mubr.f32.gmra.mrb[4].mxu0 %v2775_v27 }
  0x8b   :  { %2251 = vmatprep.mubr.msk.f32.mxu0 %vm2691_vm2, %v2692_v8 }
  0x8e   :  { %2252 = vmatmul.mubr.f32.gmra.mrb[6].mxu0 %v2796_v38 }
  0x8f   :  { %2254 = vmatprep.mubr.msk.f32.mxu0 %vm2691_vm2, %v2692_v8 }
  0x91   :  { %v55_v31 = vpop.permute.xlu0 %54 }
  0x92   :  { %2255 = vmatmul.mubr.f32.gmra.mrb[8].mxu0 %v2815_v46 }
  0x93   :  { %2257 = vmatprep.mubr.msk.f32.mxu0 %vm2691_vm2, %v2692_v8 }
  0x95   :  { %v65_v38 = vpop.permute.xlu1 %64 }
  0x96   :  { %2258 = vmatmul.mubr.f32.gmra.mrb[10].mxu0 %v2834_v53  ;;  %v60_v33 = vpop.permute.xlu0 %59 }
  0x97   :  { %2260 = vmatprep.mubr.msk.f32.mxu0 %vm2691_vm2, %v2692_v8 }
  0x99   :  { %v70_v48 = vpop.permute.xlu1 %69 }
  0x9a   :  { %2261 = vmatmul.mubr.f32.gmra.mrb[12].mxu0 %v2855_v61  ;;  %v3020_v61 = vand.u32 4294901760, %v854_v54  ;;  %v75_v62 = vpop.permute.xlu0 %74 }
  0x9c   :  { %v3038_v15 = vsub.f32 %v854_v54, %v3020_v61 }
  0xe3   :  { %v186_v16 = vpop.f32.mrb[0].mxu1 }
  0xe4   :  { %v2119_v17 = vpop.f32.mrb[1].mxu1  ;;  %v187_v32 = vadd.f32 %v186_v16, %v55_v31 }
  0xe7   :  { %v196_v19 = vpop.f32.mrb[2].mxu1 }
  0xe8   :  { %v2122_v20 = vpop.f32.mrb[3].mxu1  ;;  %v197_v35 = vadd.f32 %v196_v19, %v60_v33 }
  0xe9   :  { %v3040_v20 = vand.u32 4294901760, %v857_v6 }
  0xeb   :  { %v206_v21 = vpop.f32.mrb[4].mxu1 }
  0xec   :  { %v2125_v22 = vpop.f32.mrb[5].mxu1  ;;  %v207_v41 = vadd.f32 %v206_v21, %v65_v38  ;;  %v80_v21 = vpop.permute.xlu1 %79 }
  0xef   :  { %v216_v23 = vpop.f32.mrb[6].mxu1 }
  0xf0   :  { %v2128_v24 = vpop.f32.mrb[7].mxu1  ;;  %v217_v50 = vadd.f32 %v216_v23, %v70_v48 }
  0xf1   :  { %v860_v24 = vsel %vm852_vm3, %v44_v12, 0 }
  0xf3   :  { %v226_v25 = vpop.f32.mrb[8].mxu1 }
  0xf4   :  { %v2131_v26 = vpop.f32.mrb[9].mxu1  ;;  %v227_v4 = vadd.f32 %v226_v25, %v75_v62 }
  0xf7   :  { %v3002_v27 = vpop.f32.mrb[10].mxu1 }
  0xf8   :  { %v2134_v28 = vpop.f32.mrb[11].mxu1  ;;  %v237_v25 = vadd.f32 %v3002_v27, %v80_v21 }
  0xfb   :  { %v3004_v29 = vpop.f32.mrb[12].mxu1 }
  0xfc   :  { %v2137_v30 = vpop.f32.mrb[13].mxu1 }
 0x155   :  { %v790_v34 = vpop.f32.mrb[0].mxu0 }
 0x156   :  { %v2546_v36 = vadd.f32 %v790_v34, %v187_v32  ;;  %v2244_v37 = vpop.f32.mrb[1].mxu0  ;;  %v939_v32 = vand.u32 4294901760, %v3038_v15  ;;  %v85_v34 = vpop.permute.xlu0 %84 }
 0x157   :  { %v247_v27 = vadd.f32 %v3004_v29, %v85_v34 }
 0x158   :  { %v830_v39 = vmax.f32 %v2546_v36, 0.0  ;;  %v940_v54 = vsub.f32 %v3038_v15, %v939_v32 }
 0x159   :  { %v796_v40 = vpop.f32.mrb[2].mxu0 }
 0x15a   :  { %v866_v42 = vand.u32 4294901760, %v830_v39  ;;  %v2548_v43 = vadd.f32 %v796_v40, %v197_v35  ;;  %v2247_v44 = vpop.f32.mrb[3].mxu0 }
 0x15c   :  { %v3009_v46 = vsub.f32 %v830_v39, %v866_v42  ;;  %v831_v47 = vmax.f32 %v2548_v43, 0.0  ;;  %v3053_v39 = vsub.f32 %v857_v6, %v3040_v20  ;;  %v941_v6 = vand.u32 4294901760, %v940_v54 }
 0x15d   :  { %v802_v49 = vpop.f32.mrb[4].mxu0 }
 0x15e   :  { %v869_v51 = vand.u32 4294901760, %v831_v47  ;;  %v2550_v52 = vadd.f32 %v802_v49, %v207_v41  ;;  %v2250_v53 = vpop.f32.mrb[5].mxu0  ;;  %v970_v55 = vand.u32 4294901760, %v3009_v46  ;;  %v3058_v41 = vand.u32 4294901760, %v860_v24 }
 0x160   :  { %v3013_v56 = vpack.c.bf16 %v869_v51, %v866_v42  ;;  %v3015_v57 = vsub.f32 %v831_v47, %v869_v51  ;;  %v832_v58 = vmax.f32 %v2550_v52, 0.0  ;;  %v971_v5 = vsub.f32 %v3009_v46, %v970_v55 }
 0x161   :  { %v808_v60 = vpop.f32.mrb[6].mxu0 }
 0x162   :  { %v977_v63 = vand.u32 4294901760, %v3015_v57  ;;  %v872_v0 = vand.u32 4294901760, %v832_v58  ;;  %v2552_v1 = vadd.f32 %v808_v60, %v217_v50  ;;  %v2253_v3 = vpop.f32.mrb[7].mxu0  ;;  %2475 = vmatpush3.bf16.msra.mxu1 %v3013_v56  ;;  %v2492_v7 = vpack.c.bf16 %v3015_v57, %v3009_v46  ;;  %v48_v46 = vld [vmem:[%s3239_s5] sm:$0x1] }
 0x163   :  { %2476 = vmatprep.subr.bf16.mxu1 %v2690_v2  ;;  %v972_v22 = vand.u32 4294901760, %v971_v5 }
 0x164   :  { %v978_v9 = vsub.f32 %v3015_v57, %v977_v63  ;;  %v3030_v10 = vsub.f32 %v832_v58, %v872_v0  ;;  %v833_v11 = vmax.f32 %v2552_v1, 0.0  ;;  %v3035_v13 = vpack.c.bf16 %v977_v63, %v970_v55 }
 0x165   :  { %v814_v14 = vpop.f32.mrb[8].mxu0  ;;  %v949_v55 = vand.u32 4294901760, %v3053_v39  ;;  %v3073_v58 = vsub.f32 %v860_v24, %v3058_v41 }
 0x166   :  { %v979_v18 = vand.u32 4294901760, %v978_v9  ;;  %v875_v16 = vand.u32 4294901760, %v833_v11  ;;  %v2554_v17 = vadd.f32 %v814_v14, %v227_v4  ;;  %v2256_v19 = vpop.f32.mrb[9].mxu0  ;;  %v984_v23 = vand.u32 4294901760, %v3030_v10 }
 0x167   :  { %v950_v9 = vsub.f32 %v3053_v39, %v949_v55 }
 0x168   :  { %v3045_v26 = vpack.c.bf16 %v875_v16, %v872_v0  ;;  %v3047_v28 = vsub.f32 %v833_v11, %v875_v16  ;;  %v834_v30 = vmax.f32 %v2554_v17, 0.0  ;;  %v2483_v33 = vpack.c.bf16 %v979_v18, %v972_v22 }
 0x169   :  { %v820_v31 = vpop.f32.mrb[10].mxu0  ;;  %v985_v40 = vsub.f32 %v3030_v10, %v984_v23  ;;  %v951_v17 = vand.u32 4294901760, %v950_v9 }
 0x16a   :  { %v991_v35 = vand.u32 4294901760, %v3047_v28  ;;  %v878_v36 = vand.u32 4294901760, %v834_v30  ;;  %v2556_v37 = vadd.f32 %v820_v31, %v237_v25  ;;  %v2259_v38 = vpop.f32.mrb[11].mxu0  ;;  %2478 = vmatpush3.bf16.msra.mxu1 %v3045_v26  ;;  %v2495_v42 = vpack.c.bf16 %v3047_v28, %v3030_v10 }
 0x16b   :  { %2479 = vmatprep.subr.bf16.mxu1 %v2690_v2  ;;  %v986_v53 = vand.u32 4294901760, %v985_v40  ;;  %v959_v10 = vand.u32 4294901760, %v3073_v58 }
 0x16c   :  { %v992_v43 = vsub.f32 %v3047_v28, %v991_v35  ;;  %v3063_v44 = vsub.f32 %v834_v30, %v878_v36  ;;  %v835_v45 = vmax.f32 %v2556_v37, 0.0  ;;  %v3065_v47 = vpack.c.bf16 %v991_v35, %v984_v23  ;;  %v845_v28 = vpop.permute.xlu0 %844 }
 0x16d   :  { %v826_v48 = vpop.f32.mrb[12].mxu0  ;;  %v960_v19 = vsub.f32 %v3073_v58, %v959_v10 }
 0x16e   :  { %v993_v49 = vand.u32 4294901760, %v992_v43  ;;  %v998_v29 = vand.u32 4294901760, %v3063_v44  ;;  %v881_v50 = vand.u32 4294901760, %v835_v45  ;;  %v2558_v51 = vadd.f32 %v826_v48, %v247_v27  ;;  %v2262_v52 = vpop.f32.mrb[13].mxu0 }
 0x16f   :  { %v961_v23 = vand.u32 4294901760, %v960_v19 }
 0x170   :  { %v3075_v59 = vpack.c.bf16 %v881_v50, %v878_v36  ;;  %v1004_v60 = vsub.f32 %v835_v45, %v881_v50  ;;  %v836_v62 = vmax.f32 %v2558_v51, 0.0  ;;  %v2486_v63 = vpack.c.bf16 %v993_v49, %v986_v53 }
 0x171   :  { %v999_v0 = vsub.f32 %v3063_v44, %v998_v29 }
 0x172   :  { %v1005_v1 = vand.u32 4294901760, %v1004_v60  ;;  %v863_v3 = vsel %vm109_vm0, %v836_v62, 0  ;;  %2481 = vmatpush3.bf16.msra.mxu1 %v3075_v59  ;;  %v2498_v4 = vpack.c.bf16 %v1004_v60, %v3063_v44 }
 0x173   :  { %v3081_v5 = vand.u32 4294901760, %v863_v3  ;;  %2275 = vmatprep.subr.mxu1 %v2692_v8  ;;  %v1000_v14 = vand.u32 4294901760, %v999_v0  ;;  %v1478_v0 = vstv %s3240_s6 }
 0x174   :  { %v1006_v11 = vsub.f32 %v1004_v60, %v1005_v1  ;;  %v3088_v12 = vpack.c.bf16 %v1005_v1, %v998_v29 }
 0x175   :  { %v3091_v16 = vsub.f32 %v863_v3, %v3081_v5 }
 0x176   :  { %v1007_v18 = vand.u32 4294901760, %v1006_v11  ;;  %2276 = vmatpush3.msra.mxu1 %v3081_v5 }
 0x177   :  { %2482 = vmatprep.subr.bf16.mxu1 %v2690_v2  ;;  %2278 = vmatmul.mubr.f32.vlgmr.msra.gmra.mrb[14].mxu1 %v941_v6  ;;  %v1012_v22 = vand.u32 4294901760, %v3091_v16 }
 0x178   :  { %2484 = vmatpush3.bf16.msra.mxu1 %v2483_v33  ;;  %2280 = vmatprep.mubr.msk.f32.mxu1 %vm2691_vm2, %v2692_v8  ;;  %v2489_v21 = vpack.c.bf16 %v1007_v18, %v1000_v14 }
 0x179   :  { %2485 = vmatprep.subr.bf16.mxu1 %v2690_v2  ;;  %v1013_v24 = vsub.f32 %v3091_v16, %v1012_v22 }
 0x17b   :  { %2281 = vmatmul.mubr.f32.gmra.mrb[16].mxu1 %v951_v17  ;;  %v1014_v25 = vand.u32 4294901760, %v1013_v24 }
 0x17c   :  { %2487 = vmatpush3.bf16.msra.mxu1 %v2486_v63  ;;  %2283 = vmatprep.mubr.msk.f32.mxu1 %vm2691_vm2, %v2692_v8 }
 0x17d   :  { %2488 = vmatprep.subr.bf16.mxu1 %v2690_v2 }
 0x17f   :  { %2284 = vmatmul.mubr.f32.gmra.mrb[18].mxu1 %v961_v23 }
 0x180   :  { %2490 = vmatpush3.bf16.msra.mxu1 %v2489_v21  ;;  %2300 = vmatprep.mubr.msk.f32.mxu1 %vm2691_vm2, %v2692_v8 }
 0x181   :  { %2298 = vmatprep.subr.mxu1 %v2692_v8 }
 0x184   :  { %2299 = vmatpush3.msra.mxu1 %v1014_v25 }
 0x185   :  { %2491 = vmatprep.subr.bf16.mxu1 %v2690_v2  ;;  %2301 = vmatmul.mubr.f32.vlgmr.msra.gmra.mrb[14].mxu1 %v3020_v61 }
 0x186   :  { %2493 = vmatpush3.bf16.msra.mxu1 %v2492_v7  ;;  %2303 = vmatprep.mubr.msk.f32.mxu1 %vm2691_vm2, %v2692_v8 }
 0x187   :  { %2494 = vmatprep.subr.bf16.mxu1 %v2690_v2 }
 0x189   :  { %2304 = vmatmul.mubr.f32.gmra.mrb[16].mxu1 %v3040_v20 }
 0x18a   :  { %2496 = vmatpush3.bf16.msra.mxu1 %v2495_v42  ;;  %2306 = vmatprep.mubr.msk.f32.mxu1 %vm2691_vm2, %v2692_v8 }
 0x18b   :  { %2497 = vmatprep.subr.bf16.mxu1 %v2690_v2 }
 0x18d   :  { %2307 = vmatmul.mubr.f32.gmra.mrb[18].mxu1 %v3058_v41 }
 0x18e   :  { %2499 = vmatpush3.bf16.msra.mxu1 %v2498_v4  ;;  %2323 = vmatprep.mubr.msk.f32.mxu1 %vm2691_vm2, %v2692_v8 }
 0x18f   :  { %2321 = vmatprep.subr.mxu1 %v2692_v8 }
 0x192   :  { %2322 = vmatpush3.msra.mxu1 %v3091_v16 }
 0x193   :  { %2500 = vmatprep.subr.bf16.mxu1 %v2690_v2  ;;  %2324 = vmatmul.mubr.f32.vlgmr.msra.gmra.mrb[14].mxu1 %v3038_v15 }
 0x194   :  { %2502 = vmatpush3.bf16.msra.mxu1 %v3013_v56  ;;  %2326 = vmatprep.mubr.msk.f32.mxu1 %vm2691_vm2, %v2692_v8 }
 0x195   :  { %2503 = vmatprep.subr.bf16.mxu1 %v2690_v2 }
 0x197   :  { %2327 = vmatmul.mubr.f32.gmra.mrb[16].mxu1 %v3053_v39 }
 0x198   :  { %2505 = vmatpush3.bf16.msra.mxu1 %v3045_v26  ;;  %2329 = vmatprep.mubr.msk.f32.mxu1 %vm2691_vm2, %v2692_v8 }
 0x199   :  { %2506 = vmatprep.subr.bf16.mxu1 %v2690_v2 }
 0x19b   :  { %2330 = vmatmul.mubr.f32.gmra.mrb[18].mxu1 %v3073_v58 }
 0x19c   :  { %2508 = vmatpush3.bf16.msra.mxu1 %v3075_v59  ;;  %2346 = vmatprep.mubr.msk.f32.mxu1 %vm2691_vm2, %v2692_v8 }
 0x19d   :  { %2344 = vmatprep.subr.mxu1 %v2692_v8 }
 0x1a0   :  { %2345 = vmatpush3.msra.mxu1 %v3081_v5 }
 0x1a1   :  { %2509 = vmatprep.subr.bf16.mxu1 %v2690_v2  ;;  %2347 = vmatmul.mubr.f32.vlgmr.msra.gmra.mrb[14].mxu1 %v939_v32 }
 0x1a2   :  { %2511 = vmatpush3.bf16.msra.mxu1 %v3035_v13  ;;  %2349 = vmatprep.mubr.msk.f32.mxu1 %vm2691_vm2, %v2692_v8 }
 0x1a3   :  { %2512 = vmatprep.subr.bf16.mxu1 %v2690_v2 }
 0x1a5   :  { %2350 = vmatmul.mubr.f32.gmra.mrb[16].mxu1 %v949_v55 }
 0x1a6   :  { %2514 = vmatpush3.bf16.msra.mxu1 %v3065_v47  ;;  %2352 = vmatprep.mubr.msk.f32.mxu1 %vm2691_vm2, %v2692_v8 }
 0x1a7   :  { %2515 = vmatprep.subr.bf16.mxu1 %v2690_v2 }
 0x1a9   :  { %2353 = vmatmul.mubr.f32.gmra.mrb[18].mxu1 %v959_v10 }
 0x1aa   :  { %2517 = vmatpush3.bf16.msra.mxu1 %v3088_v12  ;;  %2369 = vmatprep.mubr.msk.f32.mxu1 %vm2691_vm2, %v2692_v8 }
 0x1ab   :  { %2367 = vmatprep.subr.mxu1 %v2692_v8 }
 0x1ae   :  { %2368 = vmatpush3.msra.mxu1 %v1012_v22 }
 0x1af   :  { %2518 = vmatprep.subr.bf16.mxu1 %v2690_v2  ;;  %2370 = vmatmul.mubr.f32.vlgmr.msra.gmra.mrb[14].mxu1 %v3020_v61 }
 0x1b0   :  { %2520 = vmatpush3.bf16.msra.mxu1 %v3013_v56  ;;  %2372 = vmatprep.mubr.msk.f32.mxu1 %vm2691_vm2, %v2692_v8  ;;  %v1481_v56 = vsel %vm1479_vm4, %v48_v46, 0 }
 0x1b1   :  { %2521 = vmatprep.subr.bf16.mxu1 %v2690_v2  ;;  %v3192_v57 = vand.u32 4294901760, %v1481_v56 }
 0x1b3   :  { %2373 = vmatmul.mubr.f32.gmra.mrb[16].mxu1 %v3040_v20 }
 0x1b4   :  { %2523 = vmatpush3.bf16.msra.mxu1 %v3045_v26  ;;  %2375 = vmatprep.mubr.msk.f32.mxu1 %vm2691_vm2, %v2692_v8 }
 0x1b5   :  { %2524 = vmatprep.subr.bf16.mxu1 %v2690_v2 }
 0x1b7   :  { %2376 = vmatmul.mubr.f32.gmra.mrb[18].mxu1 %v3058_v41 }
 0x1b8   :  { %2526 = vmatpush3.bf16.msra.mxu1 %v3075_v59  ;;  %2392 = vmatprep.mubr.msk.f32.mxu1 %vm2691_vm2, %v2692_v8 }
 0x1b9   :  { %2390 = vmatprep.subr.mxu1 %v2692_v8 }
 0x1bc   :  { %2391 = vmatpush3.msra.mxu1 %v3081_v5 }
 0x1bd   :  { %2393 = vmatmul.mubr.f32.vlgmr.msra.gmra.mrb[14].mxu1 %v3020_v61  ;;  %2527 = vmatprep.subr.bf16.mxu1 %v2690_v2  ;;  %v840_v61 = vpop.permute.xlu1 %839 }
 0x1be   :  { %2395 = vmatprep.mubr.msk.f32.mxu1 %vm2691_vm2, %v2692_v8 }
 0x1c1   :  { %2396 = vmatmul.mubr.f32.gmra.mrb[16].mxu1 %v3040_v20  ;;  %v1556_v20 = vsub.f32 %v1481_v56, %v3192_v57  ;;  %v850_v37 = vpop.permute.xlu1 %849 }
 0x1c2   :  { %2398 = vmatprep.mubr.msk.f32.mxu1 %vm2691_vm2, %v2692_v8 }
 0x1c3   :  { %v1557_v34 = vand.u32 4294901760, %v1556_v20 }
 0x1c5   :  { %2399 = vmatmul.mubr.f32.gmra.mrb[18].mxu1 %v3058_v41  ;;  %v1558_v42 = vsub.f32 %v1556_v20, %v1557_v34 }
 0x1c6   :  { %2407 = vmatprep.mubr.msk.f32.mxu1 %vm2691_vm2, %v2692_v8 }
 0x1c7   :  { %v1559_v51 = vand.u32 4294901760, %v1558_v42 }
 0x290   :  { %v1459_v7 = vpop.f32.mrb[14].mxu1 }
 0x291   :  { %v2559_v13 = vadd.f32 %v1459_v7, %v840_v61  ;;  %v2394_v15 = vpop.f32.mrb[15].mxu1 }
 0x293   :  { %v1475_v26 = vmax.f32 %v2559_v13, 0.0 }
 0x294   :  { %v1465_v30 = vpop.f32.mrb[16].mxu1 }
 0x295   :  { %v1488_v31 = vand.u32 4294901760, %v1475_v26  ;;  %v2560_v32 = vadd.f32 %v1465_v30, %v845_v28  ;;  %v2397_v33 = vpop.f32.mrb[17].mxu1 }
 0x297   :  { %v1567_v35 = vsub.f32 %v1475_v26, %v1488_v31  ;;  %v1476_v36 = vmax.f32 %v2560_v32, 0.0 }
 0x298   :  { %v1471_v38 = vpop.f32.mrb[18].mxu1 }
 0x299   :  { %v1568_v39 = vand.u32 4294901760, %v1567_v35  ;;  %v1491_v27 = vand.u32 4294901760, %v1476_v36  ;;  %v2561_v40 = vadd.f32 %v1471_v38, %v850_v37  ;;  %v2400_v41 = vpop.f32.mrb[19].mxu1 }
 0x29b   :  { %v2528_v43 = vpack.c.bf16 %v1491_v27, %v1488_v31  ;;  %v1574_v44 = vsub.f32 %v1476_v36, %v1491_v27  ;;  %v1477_v45 = vmax.f32 %v2561_v40, 0.0  ;;  %v1569_v47 = vsub.f32 %v1567_v35, %v1568_v39 }
 0x29d   :  { %v1575_v48 = vand.u32 4294901760, %v1574_v44  ;;  %v1485_v49 = vsel %vm1483_vm5, %v1477_v45, 0  ;;  %2529 = vmatpush3.bf16.msra.mxu1 %v2528_v43  ;;  %v2534_v29 = vpack.c.bf16 %v1574_v44, %v1567_v35  ;;  %v1570_v55 = vand.u32 4294901760, %v1569_v47 }
 0x29e   :  { %v1494_v50 = vand.u32 4294901760, %v1485_v49  ;;  %2405 = vmatprep.subr.mxu1 %v2692_v8 }
 0x29f   :  { %v1576_v52 = vsub.f32 %v1574_v44, %v1575_v48  ;;  %v2540_v53 = vpack.c.bf16 %v1575_v48, %v1568_v39 }
 0x2a0   :  { %v1581_v54 = vsub.f32 %v1485_v49, %v1494_v50 }
 0x2a1   :  { %v1577_v58 = vand.u32 4294901760, %v1576_v52  ;;  %2406 = vmatpush3.msra.mxu1 %v1494_v50 }
 0x2a2   :  { %v1582_v59 = vand.u32 4294901760, %v1581_v54  ;;  %2408 = vmatmul.mubr.f32.vlgmr.msra.gmra.mrb[20].mxu1 %v1559_v51  ;;  %2530 = vmatprep.subr.bf16.mxu1 %v2690_v2 }
 0x2a3   :  { %v2531_v60 = vpack.c.bf16 %v1577_v58, %v1570_v55  ;;  %2416 = vmatprep.mubr.msk.f32.mxu1 %vm2691_vm2, %v2692_v8 }
 0x2a4   :  { %v1583_v62 = vsub.f32 %v1581_v54, %v1582_v59 }
 0x2a5   :  { %2532 = vmatpush3.bf16.msra.mxu1 %v2531_v60 }
 0x2a6   :  { %2414 = vmatprep.subr.mxu1 %v2692_v8  ;;  %v1584_v63 = vand.u32 4294901760, %v1583_v62 }
 0x2a9   :  { %2415 = vmatpush3.msra.mxu1 %v1584_v63 }
 0x2aa   :  { %2417 = vmatmul.mubr.f32.vlgmr.msra.gmra.mrb[20].mxu1 %v3192_v57  ;;  %2533 = vmatprep.subr.bf16.mxu1 %v2690_v2 }
 0x2ab   :  { %2535 = vmatpush3.bf16.msra.mxu1 %v2534_v29  ;;  %2425 = vmatprep.mubr.msk.f32.mxu1 %vm2691_vm2, %v2692_v8 }
 0x2ac   :  { %2423 = vmatprep.subr.mxu1 %v2692_v8 }
 0x2af   :  { %2424 = vmatpush3.msra.mxu1 %v1581_v54 }
 0x2b0   :  { %2536 = vmatprep.subr.bf16.mxu1 %v2690_v2 }
 0x2b2   :  { %2426 = vmatmul.mubr.f32.vlgmr.msra.gmra.mrb[20].mxu1 %v1556_v20 }
 0x2b3   :  { %2538 = vmatpush3.bf16.msra.mxu1 %v2528_v43  ;;  %2434 = vmatprep.mubr.msk.f32.mxu1 %vm2691_vm2, %v2692_v8 }
 0x2b4   :  { %2432 = vmatprep.subr.mxu1 %v2692_v8 }
 0x2b7   :  { %2433 = vmatpush3.msra.mxu1 %v1494_v50 }
 0x2b8   :  { %2539 = vmatprep.subr.bf16.mxu1 %v2690_v2 }
 0x2ba   :  { %2435 = vmatmul.mubr.f32.vlgmr.msra.gmra.mrb[20].mxu1 %v1557_v34 }
 0x2bb   :  { %2541 = vmatpush3.bf16.msra.mxu1 %v2540_v53  ;;  %2443 = vmatprep.mubr.msk.f32.mxu1 %vm2691_vm2, %v2692_v8 }
 0x2bc   :  { %2441 = vmatprep.subr.mxu1 %v2692_v8 }
 0x2bf   :  { %2442 = vmatpush3.msra.mxu1 %v1582_v59 }
 0x2c0   :  { %2542 = vmatprep.subr.bf16.mxu1 %v2690_v2 }
 0x2c2   :  { %2444 = vmatmul.mubr.f32.vlgmr.msra.gmra.mrb[20].mxu1 %v3192_v57 }
 0x2c3   :  { %2544 = vmatpush3.bf16.msra.mxu1 %v2528_v43  ;;  %2452 = vmatprep.mubr.msk.f32.mxu1 %vm2691_vm2, %v2692_v8 }
 0x2c4   :  { %2450 = vmatprep.subr.mxu1 %v2692_v8 }
 0x2c7   :  { %2451 = vmatpush3.msra.mxu1 %v1494_v50 }
 0x2ca   :  { %2453 = vmatmul.mubr.f32.vlgmr.msra.gmra.mrb[20].mxu1 %v3192_v57 }
 0x39d   :  { %v1955_v1 = vpop.f32.mrb[20].mxu1 }
 0x39e   :  { %v2562_v2 = vadd.f32 %v1955_v1, %v1478_v0  ;;  %v2454_v3 = vpop.f32.mrb[21].mxu1 }
 0x3a0   :  { %1960 = vst.msk [vmem:[#allocation3] sm:$0x1] %vm1959_vm6, %v2562_v2 }
 0x3a1   :  { %2677 = shalt.err (!%p2674_p4)
}
 0x3a2   :  { %s2678_s6 = scalar_lea.hbm %s3241_s7, 16 }
 0x3a3   :  { %p2679_p5 = scmp.ne.s32.totalorder %s3241_s7, %s2678_s6  ;;  %p2682_p6 = scmp.lt.u32.totalorder %s2678_s6, %s3241_s7 }
 0x3a5   :  { %p2684_p7 = pnand %p2682_p6, %p2679_p5 }
 0x3a7   :  { %2687 = shalt.err (!%p2684_p7)
}
 0x3a8   :  { %1970 = dma.vmem_to_hbm [thread:$0]  %s1968_s19, 16, %s3241_s7, [#allocation4]  }
 0x3a9   :  { %2688 = dma.done.wait [#allocation4], 16  }
 0x3aa   :  { %2689 = vsyncadd [#allocation4], 4294967280 }
 0x3ab   :  { %1974 = vsyncpa [#allocation4], 1 }

</bundles_post_ra>
